<compile_context>
chip_gen: v6e
topology: v6e:2x2x1
jax: 0.10.0
libtpu: 0.0.40
codegen_flags: <defaults>
</compile_context>

<pallas_src>
import functools

import jax
import jax.numpy as jnp
from jax.experimental import pallas as pl
from jax.experimental.pallas import tpu as pltpu


# --------------------------------------------------------------------------- #
# Kernel
# --------------------------------------------------------------------------- #
def _acpred_sgc_kernel(pool_bias_scale,
                       x_even_ref, x_odd_ref,
                       w_sgc_ref, b_sgc_ref,
                       w1a_ref, w1b_ref, b1_ref,
                       w2_ref, b2_ref,
                       w3_ref, b3_ref,
                       out_ref):
    # SGConv projection.  Propagation + add-pool were folded into the pre-pooled
    # features in the wrapper (sum-pool(S^K X) == (1^T S^K) X); the per-node SGConv
    # bias summed over atoms becomes atom_count * b.
    w_sgc = w_sgc_ref[...]                                   # (F_in_pad, FP_pad) bf16
    b_sgc = pool_bias_scale * b_sgc_ref[...]                 # (1, FP_pad) f32

    emb_even = jnp.dot(x_even_ref[...], w_sgc,
                       preferred_element_type=jnp.float32) + b_sgc
    emb_odd = jnp.dot(x_odd_ref[...], w_sgc,
                      preferred_element_type=jnp.float32) + b_sgc

    # decompose_mol_pair fused with the first Linear:
    #   concat([even, odd], -1) @ W1 == even @ W1[:FP] + odd @ W1[FP:]
    z1 = (jnp.dot(emb_even.astype(w1a_ref.dtype), w1a_ref[...],
                  preferred_element_type=jnp.float32)
          + jnp.dot(emb_odd.astype(w1b_ref.dtype), w1b_ref[...],
                    preferred_element_type=jnp.float32)
          + b1_ref[...])
    h1 = jnp.maximum(z1, 0.0)
    z2 = jnp.dot(h1.astype(w2_ref.dtype), w2_ref[...],
                 preferred_element_type=jnp.float32) + b2_ref[...]
    h2 = jnp.maximum(z2, 0.0)
    out_ref[...] = (jnp.dot(h2.astype(w3_ref.dtype), w3_ref[...],
                            preferred_element_type=jnp.float32)
                    + b3_ref[...]).astype(out_ref.dtype)


# --------------------------------------------------------------------------- #
# Wrapper
# --------------------------------------------------------------------------- #
def _round_up(x, m):
    return ((x + m - 1) // m) * m


def _pad_to(arr, shape):
    return jnp.pad(arr, [(0, t - s) for s, t in zip(arr.shape, shape)])


def _default_pairs_per_tile(n_pairs):
    # Prefer large, MXU-width-aligned tiles (M dimension of the DNN matmuls), while
    # keeping >= 2 grid steps when possible so v7x's two TensorCores both get work.
    for cand in (512, 256, 128, 64, 32, 16, 8):
        if n_pairs >= 2 * cand:
            return cand
    return min(512, _round_up(max(n_pairs, 1), 8))


def acpred_sgc_forward(S_blocks, X_blocks, params, K, *,
                       pairs_per_tile=None, lane=128, compute_dtype=jnp.bfloat16):
    """Fused SGC + pair-decompose + DNN forward.

    S_blocks: (MolNum, A, A) per-molecule normalized adjacency (block-diagonal graph).
    X_blocks: (MolNum, A, F_in) per-molecule node features (uniform atom count A).
    params:   unpadded f32 weights: w_sgc (F_in,FP), b_sgc (1,FP), w1 (2FP,H1), b1,
              w2 (H1,H2), b2, w3 (H2,Out), b3.
    """
    mol_num, atoms_per_mol, f_in = X_blocks.shape
    assert S_blocks.shape == (mol_num, atoms_per_mol, atoms_per_mol)
    assert mol_num % 2 == 0
    n_pairs = mol_num // 2

    fp = params['w_sgc'].shape[1]
    h1 = params['w1'].shape[1]
    h2 = params['w2'].shape[1]
    out_size = params['w3'].shape[1]
    f_in_p, fp_p, h1_p, h2_p, out_p = (_round_up(d, lane)
                                       for d in (f_in, fp, h1, h2, out_size))

    if pairs_per_tile is None:
        tile = _default_pairs_per_tile(n_pairs)
    else:
        tile = _round_up(int(pairs_per_tile), 8)
    n_pairs_pad = _round_up(n_pairs, tile)

    # ---- collapse SGConv propagation + add-pool: sum-pool(S^K X) == (1^T S^K) X ---- #
    # K tiny batched vec-mat products in f32 (exact), done once in XLA.
    w_pool = jnp.ones((mol_num, atoms_per_mol), jnp.float32)
    S_f32 = S_blocks.astype(jnp.float32)
    for _ in range(int(K)):
        w_pool = jnp.einsum('ma,mab->mb', w_pool, S_f32)
    pooled = jnp.einsum('ma,maf->mf', w_pool, X_blocks.astype(jnp.float32))  # (MolNum, F_in)

    # ---- even/odd (first/second molecule of each AC pair) split, lane-pad, cast ---- #
    def split_pad_cast(feat):
        even, odd = feat[0::2], feat[1::2]
        target = (n_pairs_pad, f_in_p)
        return _pad_to(even, target).astype(compute_dtype), \
               _pad_to(odd, target).astype(compute_dtype)

    x_even, x_odd = split_pad_cast(pooled)

    # ---- lane-pad weights to 128 and cast; biases stay f32 (post-accum adds) ------- #
    w_sgc = _pad_to(params['w_sgc'], (f_in_p, fp_p)).astype(compute_dtype)
    b_sgc = _pad_to(params['b_sgc'].reshape(1, fp), (1, fp_p)).astype(jnp.float32)
    w1 = params['w1']
    w1a = _pad_to(w1[:fp], (fp_p, h1_p)).astype(compute_dtype)
    w1b = _pad_to(w1[fp:], (fp_p, h1_p)).astype(compute_dtype)
    b1 = _pad_to(params['b1'].reshape(1, h1), (1, h1_p)).astype(jnp.float32)
    w2 = _pad_to(params['w2'], (h1_p, h2_p)).astype(compute_dtype)
    b2 = _pad_to(params['b2'].reshape(1, h2), (1, h2_p)).astype(jnp.float32)
    w3 = _pad_to(params['w3'], (h2_p, out_p)).astype(compute_dtype)
    b3 = _pad_to(params['b3'].reshape(1, out_size), (1, out_p)).astype(jnp.float32)

    grid = (n_pairs_pad // tile,)

    def tiled_spec(arr):               # streamed, auto-pipelined per pair-tile
        return pl.BlockSpec((tile,) + arr.shape[1:], lambda i: (i, 0))

    def resident_spec(arr):            # constant block index -> stays resident in VMEM
        nd = arr.ndim
        return pl.BlockSpec(arr.shape, lambda i, _nd=nd: (0,) * _nd)

    streamed = (x_even, x_odd)
    resident = (w_sgc, b_sgc, w1a, w1b, b1, w2, b2, w3, b3)
    inputs = streamed + resident
    in_specs = [tiled_spec(a) for a in streamed] + [resident_spec(a) for a in resident]
    out_spec = pl.BlockSpec((tile, out_p), lambda i: (i, 0))

    # ---- generation-aware scoped-VMEM budget (double buffering included) ---------- #
    stream_tile_bytes = sum(tile * a.shape[1] * a.dtype.itemsize for a in streamed) \
        + tile * out_p * 4
    resident_bytes = sum(a.size * a.dtype.itemsize for a in resident)
    try:
        vmem_capacity = int(getattr(pltpu.get_tpu_info(), "vmem_capacity_bytes",
                                    64 << 20))
    except Exception:                  # pragma: no cover - non-TPU / older runtimes
        vmem_capacity = 64 << 20
    vmem_cap = int(0.6 * vmem_capacity)
    vmem_limit_bytes = int(min(vmem_cap,
                               max(4 << 20,
                                   4 * stream_tile_bytes + 2 * resident_bytes
                                   + (2 << 20))))

    flops = 2 * n_pairs_pad * (2 * f_in_p * fp_p + 2 * fp_p * h1_p
                               + h1_p * h2_p + h2_p * out_p)
    bytes_accessed = (sum(a.size * a.dtype.itemsize for a in inputs)
                      + n_pairs_pad * out_p * 4)
    cost = pl.CostEstimate(flops=int(flops), transcendentals=0,
                           bytes_accessed=int(bytes_accessed))

    out = pl.pallas_call(
        functools.partial(_acpred_sgc_kernel, float(atoms_per_mol)),
        out_shape=jax.ShapeDtypeStruct((n_pairs_pad, out_p), jnp.float32),
        grid_spec=pltpu.PrefetchScalarGridSpec(
            num_scalar_prefetch=0, grid=grid,
            in_specs=in_specs, out_specs=out_spec),
        compiler_params=pltpu.CompilerParams(
            dimension_semantics=("parallel",),
            vmem_limit_bytes=vmem_limit_bytes),
        cost_estimate=cost,
    )(*inputs)
    return out[:n_pairs, :out_size]


# --------------------------------------------------------------------------- #
# Demo / self-test
# --------------------------------------------------------------------------- #
if __name__ == "__main__":
    MOL_NUM = 32            # number of molecules (even: they form AC pairs)
    ATOMS_PER_MOL = 8
    F_IN = 16               # raw atom feature size
    FP_SIZE = 32            # opt.args['FPSize']
    DNN_LAYERS = [64, 32]   # opt.args['DNNLayers']
    OUT_SIZE = 2            # opt.args['OutputSize']
    K_HOPS = 3              # SGConv K

    key = jax.random.PRNGKey(0)
    keys = jax.random.split(key, 10)

    # node features, per molecule
    X_blocks = jax.random.normal(keys[0], (MOL_NUM, ATOMS_PER_MOL, F_IN), jnp.float32)

    # per-molecule symmetric random adjacency + self loops, symmetric normalization
    adj = (jax.random.uniform(keys[1], (MOL_NUM, ATOMS_PER_MOL, ATOMS_PER_MOL)) < 0.3)
    adj = jnp.logical_or(adj, jnp.transpose(adj, (0, 2, 1))).astype(jnp.float32)
    eye = jnp.eye(ATOMS_PER_MOL, dtype=jnp.float32)
    adj = adj * (1.0 - eye) + eye
    deg = adj.sum(axis=2)
    dinv = 1.0 / jnp.sqrt(deg)
    S_blocks = adj * dinv[:, :, None] * dinv[:, None, :]   # D^-1/2 (A+I) D^-1/2, per mol

    def lin(k, fi, fo):
        return jax.random.normal(k, (fi, fo), jnp.float32) / jnp.sqrt(fi)

    params = dict(
        w_sgc=lin(keys[2], F_IN, FP_SIZE),
        b_sgc=0.01 * jax.random.normal(keys[3], (1, FP_SIZE), jnp.float32),
        w1=lin(keys[4], 2 * FP_SIZE, DNN_LAYERS[0]),
        b1=0.01 * jax.random.normal(keys[5], (1, DNN_LAYERS[0]), jnp.float32),
        w2=lin(keys[6], DNN_LAYERS[0], DNN_LAYERS[1]),
        b2=0.01 * jax.random.normal(keys[7], (1, DNN_LAYERS[1]), jnp.float32),
        w3=lin(keys[8], DNN_LAYERS[1], OUT_SIZE),
        b3=0.01 * jax.random.normal(keys[9], (1, OUT_SIZE), jnp.float32),
    )

    out = acpred_sgc_forward(S_blocks, X_blocks, params, K_HOPS)
    out = jax.block_until_ready(out)
    assert out.shape == (MOL_NUM // 2, OUT_SIZE)
    assert bool(jnp.all(jnp.isfinite(out)))

    # pure-JAX f32 reference of the original module's forward
    def reference(S, X, p, K):
        h = X
        for _ in range(K):
            h = jnp.einsum('mij,mjf->mif', S, h)
        h = jnp.einsum('maf,fo->mao', h, p['w_sgc']) + p['b_sgc']   # per-node SGConv bias
        emb = h.sum(axis=1)                                          # global_add_pool
        pairs = emb.reshape(emb.shape[0] // 2, -1)                   # decompose_mol_pair
        z1 = jnp.maximum(pairs @ p['w1'] + p['b1'], 0.0)
        z2 = jnp.maximum(z1 @ p['w2'] + p['b2'], 0.0)
        return z2 @ p['w3'] + p['b3']

    ref = reference(S_blocks, X_blocks, params, K_HOPS)
    err = float(jnp.max(jnp.abs(out - ref)))
    tol = 0.05 + 0.05 * float(jnp.max(jnp.abs(ref)))                 # bf16 compute tolerance
    assert err < tol, f"mismatch vs f32 reference: {err} (tol {tol})"
    print("KERNEL_OK")
</pallas_src>

<mosaic_0001>
module attributes {stable_mosaic.version = 11 : i64} {
  func.func @_acpred_sgc_kernel(%arg0: i32, %arg1: memref<8x128xbf16, #tpu.memory_space<vmem>>, %arg2: memref<8x128xbf16, #tpu.memory_space<vmem>>, %arg3: memref<128x128xbf16, #tpu.memory_space<vmem>>, %arg4: memref<1x128xf32, #tpu.memory_space<vmem>>, %arg5: memref<128x128xbf16, #tpu.memory_space<vmem>>, %arg6: memref<128x128xbf16, #tpu.memory_space<vmem>>, %arg7: memref<1x128xf32, #tpu.memory_space<vmem>>, %arg8: memref<128x128xbf16, #tpu.memory_space<vmem>>, %arg9: memref<1x128xf32, #tpu.memory_space<vmem>>, %arg10: memref<128x128xbf16, #tpu.memory_space<vmem>>, %arg11: memref<1x128xf32, #tpu.memory_space<vmem>>, %arg12: memref<8x128xf32, #tpu.memory_space<vmem>>) attributes {dimension_semantics = [#tpu.dimension_semantics<parallel>], iteration_bounds = array<i64: 2>, scalar_prefetch = 0 : i64, scratch_operands = 0 : i64, tpu.core_type = #tpu.core_type<tc>, window_params = [{transform_indices = @transform_0, window_bounds = array<i64: 8, 128>}, {transform_indices = @transform_1, window_bounds = array<i64: 8, 128>}, {pipeline_mode = #tpu.pipeline_mode<synchronous>, transform_indices = @transform_2, window_bounds = array<i64: 128, 128>}, {pipeline_mode = #tpu.pipeline_mode<synchronous>, transform_indices = @transform_3, window_bounds = array<i64: 1, 128>}, {pipeline_mode = #tpu.pipeline_mode<synchronous>, transform_indices = @transform_4, window_bounds = array<i64: 128, 128>}, {pipeline_mode = #tpu.pipeline_mode<synchronous>, transform_indices = @transform_5, window_bounds = array<i64: 128, 128>}, {pipeline_mode = #tpu.pipeline_mode<synchronous>, transform_indices = @transform_6, window_bounds = array<i64: 1, 128>}, {pipeline_mode = #tpu.pipeline_mode<synchronous>, transform_indices = @transform_7, window_bounds = array<i64: 128, 128>}, {pipeline_mode = #tpu.pipeline_mode<synchronous>, transform_indices = @transform_8, window_bounds = array<i64: 1, 128>}, {pipeline_mode = #tpu.pipeline_mode<synchronous>, transform_indices = @transform_9, window_bounds = array<i64: 128, 128>}, {pipeline_mode = #tpu.pipeline_mode<synchronous>, transform_indices = @transform_10, window_bounds = array<i64: 1, 128>}, {transform_indices = @transform_11, window_bounds = array<i64: 8, 128>}]} {
    %c0 = arith.constant 0 : index
    %c0_0 = arith.constant 0 : index
    %0 = vector.load %arg3[%c0, %c0_0] : memref<128x128xbf16, #tpu.memory_space<vmem>>, vector<128x128xbf16>
    %c0_1 = arith.constant 0 : index
    %c0_2 = arith.constant 0 : index
    %1 = vector.load %arg4[%c0_1, %c0_2] : memref<1x128xf32, #tpu.memory_space<vmem>>, vector<1x128xf32>
    %cst = arith.constant 8.000000e+00 : f32
    %2 = vector.broadcast %cst : f32 to vector<1x128xf32>
    %3 = arith.mulf %2, %1 : vector<1x128xf32>
    %c0_3 = arith.constant 0 : index
    %c0_4 = arith.constant 0 : index
    %4 = vector.load %arg1[%c0_3, %c0_4] : memref<8x128xbf16, #tpu.memory_space<vmem>>, vector<8x128xbf16>
    %cst_5 = arith.constant dense<0.000000e+00> : vector<8x128xf32>
    %5 = tpu.matmul %4, %0, %cst_5 {dimension_numbers = #tpu.dot_dimension_numbers<[1], [0], [0], [1], [0, 0, 1, 1], [], []>} : vector<8x128xbf16>, vector<128x128xbf16>, vector<8x128xf32> -> vector<8x128xf32>
    %6 = vector.broadcast %3 : vector<1x128xf32> to vector<8x128xf32>
    %7 = arith.addf %5, %6 : vector<8x128xf32>
    %c0_6 = arith.constant 0 : index
    %c0_7 = arith.constant 0 : index
    %8 = vector.load %arg2[%c0_6, %c0_7] : memref<8x128xbf16, #tpu.memory_space<vmem>>, vector<8x128xbf16>
    %cst_8 = arith.constant dense<0.000000e+00> : vector<8x128xf32>
    %9 = tpu.matmul %8, %0, %cst_8 {dimension_numbers = #tpu.dot_dimension_numbers<[1], [0], [0], [1], [0, 0, 1, 1], [], []>} : vector<8x128xbf16>, vector<128x128xbf16>, vector<8x128xf32> -> vector<8x128xf32>
    %10 = vector.broadcast %3 : vector<1x128xf32> to vector<8x128xf32>
    %11 = arith.addf %9, %10 : vector<8x128xf32>
    %12 = arith.truncf %7 : vector<8x128xf32> to vector<8x128xbf16>
    %c0_9 = arith.constant 0 : index
    %c0_10 = arith.constant 0 : index
    %13 = vector.load %arg5[%c0_9, %c0_10] : memref<128x128xbf16, #tpu.memory_space<vmem>>, vector<128x128xbf16>
    %cst_11 = arith.constant dense<0.000000e+00> : vector<8x128xf32>
    %14 = tpu.matmul %12, %13, %cst_11 {dimension_numbers = #tpu.dot_dimension_numbers<[1], [0], [0], [1], [0, 0, 1, 1], [], []>} : vector<8x128xbf16>, vector<128x128xbf16>, vector<8x128xf32> -> vector<8x128xf32>
    %15 = arith.truncf %11 : vector<8x128xf32> to vector<8x128xbf16>
    %c0_12 = arith.constant 0 : index
    %c0_13 = arith.constant 0 : index
    %16 = vector.load %arg6[%c0_12, %c0_13] : memref<128x128xbf16, #tpu.memory_space<vmem>>, vector<128x128xbf16>
    %cst_14 = arith.constant dense<0.000000e+00> : vector<8x128xf32>
    %17 = tpu.matmul %15, %16, %cst_14 {dimension_numbers = #tpu.dot_dimension_numbers<[1], [0], [0], [1], [0, 0, 1, 1], [], []>} : vector<8x128xbf16>, vector<128x128xbf16>, vector<8x128xf32> -> vector<8x128xf32>
    %18 = arith.addf %14, %17 : vector<8x128xf32>
    %c0_15 = arith.constant 0 : index
    %c0_16 = arith.constant 0 : index
    %19 = vector.load %arg7[%c0_15, %c0_16] : memref<1x128xf32, #tpu.memory_space<vmem>>, vector<1x128xf32>
    %20 = vector.broadcast %19 : vector<1x128xf32> to vector<8x128xf32>
    %21 = arith.addf %18, %20 : vector<8x128xf32>
    %cst_17 = arith.constant 0.000000e+00 : f32
    %22 = vector.broadcast %cst_17 : f32 to vector<8x128xf32>
    %23 = arith.maximumf %21, %22 : vector<8x128xf32>
    %24 = arith.truncf %23 : vector<8x128xf32> to vector<8x128xbf16>
    %c0_18 = arith.constant 0 : index
    %c0_19 = arith.constant 0 : index
    %25 = vector.load %arg8[%c0_18, %c0_19] : memref<128x128xbf16, #tpu.memory_space<vmem>>, vector<128x128xbf16>
    %cst_20 = arith.constant dense<0.000000e+00> : vector<8x128xf32>
    %26 = tpu.matmul %24, %25, %cst_20 {dimension_numbers = #tpu.dot_dimension_numbers<[1], [0], [0], [1], [0, 0, 1, 1], [], []>} : vector<8x128xbf16>, vector<128x128xbf16>, vector<8x128xf32> -> vector<8x128xf32>
    %c0_21 = arith.constant 0 : index
    %c0_22 = arith.constant 0 : index
    %27 = vector.load %arg9[%c0_21, %c0_22] : memref<1x128xf32, #tpu.memory_space<vmem>>, vector<1x128xf32>
    %28 = vector.broadcast %27 : vector<1x128xf32> to vector<8x128xf32>
    %29 = arith.addf %26, %28 : vector<8x128xf32>
    %cst_23 = arith.constant 0.000000e+00 : f32
    %30 = vector.broadcast %cst_23 : f32 to vector<8x128xf32>
    %31 = arith.maximumf %29, %30 : vector<8x128xf32>
    %32 = arith.truncf %31 : vector<8x128xf32> to vector<8x128xbf16>
    %c0_24 = arith.constant 0 : index
    %c0_25 = arith.constant 0 : index
    %33 = vector.load %arg10[%c0_24, %c0_25] : memref<128x128xbf16, #tpu.memory_space<vmem>>, vector<128x128xbf16>
    %cst_26 = arith.constant dense<0.000000e+00> : vector<8x128xf32>
    %34 = tpu.matmul %32, %33, %cst_26 {dimension_numbers = #tpu.dot_dimension_numbers<[1], [0], [0], [1], [0, 0, 1, 1], [], []>} : vector<8x128xbf16>, vector<128x128xbf16>, vector<8x128xf32> -> vector<8x128xf32>
    %c0_27 = arith.constant 0 : index
    %c0_28 = arith.constant 0 : index
    %35 = vector.load %arg11[%c0_27, %c0_28] : memref<1x128xf32, #tpu.memory_space<vmem>>, vector<1x128xf32>
    %36 = vector.broadcast %35 : vector<1x128xf32> to vector<8x128xf32>
    %37 = arith.addf %34, %36 : vector<8x128xf32>
    %c0_29 = arith.constant 0 : index
    %c0_30 = arith.constant 0 : index
    %38 = vector.load %arg12[%c0_29, %c0_30] : memref<8x128xf32, #tpu.memory_space<vmem>>, vector<8x128xf32>
    tpu.vector_store %arg12[%c0_29, %c0_30], %37 {strides = array<i32>} : memref<8x128xf32, #tpu.memory_space<vmem>>, vector<8x128xf32>,
    return
  }
  func.func @transform_0(%arg0: i32) -> (i32, i32) {
    %c0_i32 = arith.constant 0 : i32
    %c0_i32_0 = arith.constant 0 : i32
    return %arg0, %c0_i32 : i32, i32
  }
  func.func @transform_1(%arg0: i32) -> (i32, i32) {
    %c0_i32 = arith.constant 0 : i32
    %c0_i32_0 = arith.constant 0 : i32
    return %arg0, %c0_i32 : i32, i32
  }
  func.func @transform_2(%arg0: i32) -> (i32, i32) {
    %c0_i32 = arith.constant 0 : i32
    %c0_i32_0 = arith.constant 0 : i32
    %c0_i32_1 = arith.constant 0 : i32
    return %c0_i32, %c0_i32_0 : i32, i32
  }
  func.func @transform_3(%arg0: i32) -> (i32, i32) {
    %c0_i32 = arith.constant 0 : i32
    %c0_i32_0 = arith.constant 0 : i32
    %c0_i32_1 = arith.constant 0 : i32
    return %c0_i32, %c0_i32_0 : i32, i32
  }
  func.func @transform_4(%arg0: i32) -> (i32, i32) {
    %c0_i32 = arith.constant 0 : i32
    %c0_i32_0 = arith.constant 0 : i32
    %c0_i32_1 = arith.constant 0 : i32
    return %c0_i32, %c0_i32_0 : i32, i32
  }
  func.func @transform_5(%arg0: i32) -> (i32, i32) {
    %c0_i32 = arith.constant 0 : i32
    %c0_i32_0 = arith.constant 0 : i32
    %c0_i32_1 = arith.constant 0 : i32
    return %c0_i32, %c0_i32_0 : i32, i32
  }
  func.func @transform_6(%arg0: i32) -> (i32, i32) {
    %c0_i32 = arith.constant 0 : i32
    %c0_i32_0 = arith.constant 0 : i32
    %c0_i32_1 = arith.constant 0 : i32
    return %c0_i32, %c0_i32_0 : i32, i32
  }
  func.func @transform_7(%arg0: i32) -> (i32, i32) {
    %c0_i32 = arith.constant 0 : i32
    %c0_i32_0 = arith.constant 0 : i32
    %c0_i32_1 = arith.constant 0 : i32
    return %c0_i32, %c0_i32_0 : i32, i32
  }
  func.func @transform_8(%arg0: i32) -> (i32, i32) {
    %c0_i32 = arith.constant 0 : i32
    %c0_i32_0 = arith.constant 0 : i32
    %c0_i32_1 = arith.constant 0 : i32
    return %c0_i32, %c0_i32_0 : i32, i32
  }
  func.func @transform_9(%arg0: i32) -> (i32, i32) {
    %c0_i32 = arith.constant 0 : i32
    %c0_i32_0 = arith.constant 0 : i32
    %c0_i32_1 = arith.constant 0 : i32
    return %c0_i32, %c0_i32_0 : i32, i32
  }
  func.func @transform_10(%arg0: i32) -> (i32, i32) {
    %c0_i32 = arith.constant 0 : i32
    %c0_i32_0 = arith.constant 0 : i32
    %c0_i32_1 = arith.constant 0 : i32
    return %c0_i32, %c0_i32_0 : i32, i32
  }
  func.func @transform_11(%arg0: i32) -> (i32, i32) {
    %c0_i32 = arith.constant 0 : i32
    %c0_i32_0 = arith.constant 0 : i32
    return %arg0, %c0_i32 : i32, i32
  }
}

</mosaic_0001>

<bundles_post_ra>
// kernel: tpu_custom_call.1
= control target key start
LH: loop header
LB: loop body
LE: loop exit
PB: predicated region body
PF: predicated region fallthrough
CT: control target
= control target key end

     0   :  { %s2346_s0 = inlined_call_operand.hbm [shape: bf16[16,128], index: 0, kind: input, shape index: {}]   ;;  %s2347_s1 = inlined_call_operand.hbm [shape: bf16[16,128], index: 1, kind: input, shape index: {}]   ;;  %s2348_s2 = inlined_call_operand.hbm [shape: bf16[128,128], index: 2, kind: input, shape index: {}]   ;;  %s2349_s3 = inlined_call_operand.vmem [shape: f32[1,128], index: 3, kind: input, shape index: {}]   ;;  %s2350_s4 = inlined_call_operand.hbm [shape: bf16[128,128], index: 4, kind: input, shape index: {}]   ;;  %s2351_s5 = inlined_call_operand.hbm [shape: bf16[128,128], index: 5, kind: input, shape index: {}]   ;;  %s2352_s6 = inlined_call_operand.vmem [shape: f32[1,128], index: 6, kind: input, shape index: {}]   ;;  %s2353_s7 = inlined_call_operand.hbm [shape: bf16[128,128], index: 7, kind: input, shape index: {}]   ;;  %s2354_s8 = inlined_call_operand.vmem [shape: f32[1,128], index: 8, kind: input, shape index: {}]   ;;  %s2355_s9 = inlined_call_operand.hbm [shape: bf16[128,128], index: 9, kind: input, shape index: {}]   ;;  %s2356_s10 = inlined_call_operand.vmem [shape: f32[1,128], index: 10, kind: input, shape index: {}]   ;;  %s2357_s11 = inlined_call_operand.hbm [shape: f32[16,128], index: 11, kind: output, shape index: {}]  }
   0x1   :  { %2365 = sst [smem:[#allocation24_spill]] %s2348_s2 }
   0x2   :  { %2366 = sst [smem:[#allocation25_spill]] %s2350_s4 }
   0x3   :  { %2367 = sst [smem:[#allocation26_spill]] %s2351_s5 }
   0x4   :  { %2368 = sst [smem:[#allocation27_spill]] %s2353_s7 }
   0x5   :  { %2369 = sst [smem:[#allocation28_spill]] %s2355_s9 }
   0x6   :  { %16 = vsyncpa [#allocation3], 0 }
   0x7   :  { %18 = vsyncpa [#allocation3 + $0x1], 0 }
   0x8   :  { %19 = vsyncpa [#allocation6], 0 }
   0x9   :  { %21 = vsyncpa [#allocation6 + $0x1], 0 }
   0xa   :  { %22 = vsyncpa [#allocation9], 0 }
   0xb   :  { %23 = vsyncpa [#allocation12], 0 }
   0xc   :  { %24 = vsyncpa [#allocation4], 0 }
   0xd   :  { %26 = vsyncpa [#allocation4 + $0x1], 0  ;;  %s1993_s17 = smov 0   ;;  %s1995_s18 = smov 0  }
   0xe   :  { %s1997_s19 = smov 0   ;;  %s1999_s20 = smov 0  }
   0xf LB: > { %2370 = sst [smem:[#allocation21_spill]] %s1915_s19  ;;  %s1921_s21 = smov [#allocation7]   ;;  %s1919_s20 = sphi %s1999_s20, %s2396_s20   ;;  %s1915_s19 = sphi %s1997_s19, %s2398_s19   ;;  %s1911_s18 = sphi %s1995_s18, %s2400_s18   ;;  %s1907_s17 = sphi %s1993_s17, %s2399_s17  }
  0x10   : > { %s316_s22 = sshll.u32 %s1921_s21, 4  ;;  %s2014_s23 = sadd.s32 4294967295, %s1919_s20   ;;  %s317_s22 = int_to_ptr.vmem [resolvable:$true] %s316_s22 }
  0x11   : > { %p1266_p0 = scmp.ge.s32.totalorder %s1919_s20, 1  ;;  %p2361_p1 = scmp.eq.s32.totalorder %s2014_s23, 0 }
  0x12   : > { %p304_p2 = scmp.lt.s32.totalorder %s1919_s20, 3  ;;  %s1922_s25 = smov [#allocation8]  }
  0x13   : > { %s332_s26 = sshll.u32 %s1922_s25, 4  ;;  %s1923_s28 = smov [#allocation11]   ;;  %s2032_s26 = int_to_ptr.vmem [resolvable:$true] %s332_s26 }
  0x14   : > { %p2019_p3 = pnand %p1266_p0, %p304_p2  ;;  %s361_s29 = sshll.u32 %s1923_s28, 4  ;;  %s2034_s29 = int_to_ptr.vmem [resolvable:$true] %s361_s29 }
  0x15   : > { %s1664_s12 = scalar_lea.vmem %s317_s22, 1024  ;;  %p1672_p11 = scmp.lt.s32.totalorder %s317_s22, %s317_s22 }
  0x16   : > { %s2371_s24 = scalar_select %p2019_p3, 1, 0 }
  0x17   : > { %p1533_p5 = pneg %p2019_p3  ;;  %p1665_p8 = scmp.ne.s32.totalorder %s317_s22, %s1664_s12 }
  0x18   : > { %p1673_p12 = scmp.lt.s32.totalorder %s1664_s12, %s1664_s12 }
  0x19   : > { %p2028_p6 = pnand %p1533_p5, %p2361_p1 }
  0x1a   : > { %p1674_p13 = por %p1673_p12, %p1672_p11 }
  0x1b   : > { %p2038_p7 = pneg %p2028_p6 }
  0x1d   : > { %p1667_p9 = pnand %p1665_p8, %p2038_p7 }
  0x1f   : > { %p1668_p10 = pneg %p1667_p9 }
  0x21   : > { %p1675_p0 = pnand %p1674_p13, %p1668_p10 }
  0x23   : > { %1678 = shalt.err (!%p1675_p0)
}
  0x24   : > { %s1924_s13 = smov 64   ;;  %s1925_s14 = smov 4  }
  0x25   : > { %s2374_s2 = sld [smem:[#allocation24_spill]]  ;;  %s1690_s21 = scalar_lea.vmem %s2032_s26, 1024 }
  0x26   : > { %p1691_p2 = scmp.ne.s32.totalorder %s2032_s26, %s1690_s21  ;;  %p1698_p9 = scmp.lt.s32.totalorder %s2032_s26, %s2032_s26 }
  0x27   : > { %p1699_p10 = scmp.lt.s32.totalorder %s1690_s21, %s1690_s21 }
  0x28   : > { %p1693_p5 = pnand %p1691_p2, %p2038_p7 }
  0x29   : > { %p1700_p11 = por %p1699_p10, %p1698_p9 }
  0x2a   : > { %p1694_p8 = pneg %p1693_p5 }
  0x2b   : > { %1536 = dma.hbm_to_vmem [thread:$0]  (!%p2028_p6), %s2374_s2, 1024, %s317_s22, [#allocation6], %s1924_s13, %s1924_s13, %s1925_s14  }
  0x2c   : > { %p1701_p12 = pnand %p1700_p11, %p1694_p8 }
  0x2e   : > { %1704 = shalt.err (!%p1701_p12)
}
  0x2f   : > { %s2375_s4 = sld [smem:[#allocation25_spill]]  ;;  %s1716_s22 = scalar_lea.vmem %s2034_s29, 1024 }
  0x30   : > { %p1717_p13 = scmp.ne.s32.totalorder %s2034_s29, %s1716_s22  ;;  %p1724_p5 = scmp.lt.s32.totalorder %s2034_s29, %s2034_s29 }
  0x31   : > { %p1725_p8 = scmp.lt.s32.totalorder %s1716_s22, %s1716_s22 }
  0x32   : > { %p1719_p0 = pnand %p1717_p13, %p2038_p7 }
  0x33   : > { %p1726_p9 = por %p1725_p8, %p1724_p5 }
  0x34   : > { %p1720_p2 = pneg %p1719_p0 }
  0x35   : > { %1539 = dma.hbm_to_vmem [thread:$0]  (!%p2028_p6), %s2375_s4, 1024, %s2032_s26, [#allocation9], %s1924_s13, %s1924_s13, %s1925_s14  }
  0x36   : > { %p1727_p10 = pnand %p1726_p9, %p1720_p2 }
  0x38   : > { %1730 = shalt.err (!%p1727_p10)
}
  0x39   : > { %s2376_s7 = sld [smem:[#allocation27_spill]]  ;;  %s1926_s26 = smov [#allocation10]  }
  0x3a   : > { %s345_s16 = sshll.u32 %s1926_s26, 4  ;;  %s1927_s21 = smov [#allocation13]   ;;  %s346_s16 = int_to_ptr.vmem [resolvable:$true] %s345_s16 }
  0x3b   : > { %s377_s25 = sshll.u32 %s1927_s21, 4  ;;  %s1742_s28 = scalar_lea.vmem %s346_s16, 1024  ;;  %s378_s25 = int_to_ptr.vmem [resolvable:$true] %s377_s25 }
  0x3c   : > { %p1743_p11 = scmp.ne.s32.totalorder %s346_s16, %s1742_s28  ;;  %p1750_p0 = scmp.lt.s32.totalorder %s346_s16, %s346_s16 }
  0x3d   : > { %p1751_p2 = scmp.lt.s32.totalorder %s1742_s28, %s1742_s28 }
  0x3e   : > { %p1745_p12 = pnand %p1743_p11, %p2038_p7 }
  0x3f   : > { %1545 = dma.hbm_to_vmem [thread:$0]  (!%p2028_p6), %s2376_s7, 1024, %s2034_s29, [#allocation12], %s1924_s13, %s1924_s13, %s1925_s14  }
  0x40   : > { %p1746_p13 = pneg %p1745_p12  ;;  %p1752_p5 = por %p1751_p2, %p1750_p0 }
  0x42   : > { %p1753_p8 = pnand %p1752_p5, %p1746_p13 }
  0x44   : > { %1756 = shalt.err (!%p1753_p8)
}
  0x45   : > { %s2377_s5 = sld [smem:[#allocation26_spill]]  ;;  %s1768_s12 = scalar_lea.vmem %s378_s25, 1024 }
  0x46   : > { %p1769_p9 = scmp.ne.s32.totalorder %s378_s25, %s1768_s12  ;;  %p1776_p12 = scmp.lt.s32.totalorder %s378_s25, %s378_s25 }
  0x47   : > { %p1777_p0 = scmp.lt.s32.totalorder %s1768_s12, %s1768_s12 }
  0x48   : > { %p1771_p10 = pnand %p1769_p9, %p2038_p7 }
  0x49   : > { %p1778_p13 = por %p1777_p0, %p1776_p12 }
  0x4a   : > { %p1772_p11 = pneg %p1771_p10 }
  0x4b   : > { %1542 = dma.hbm_to_vmem [thread:$0]  (!%p2028_p6), %s2377_s5, 1024, %s346_s16, [#allocation9], %s1924_s13, %s1924_s13, %s1925_s14  }
  0x4c   : > { %p1779_p2 = pnand %p1778_p13, %p1772_p11 }
  0x4e   : > { %1782 = shalt.err (!%p1779_p2)
}
  0x4f   : > { %s2378_s9 = sld [smem:[#allocation28_spill]]  ;;  %s1265_s27 = sadd.s32 4294967294, %s1919_s20  }
  0x50   : > { %s2104_s30 = sadd.s32 1, %s1919_s20   ;;  %s39_s16 = sadd.s32 1, %s1915_s19 }
  0x51   : > { %2379 = sst [smem:[#allocation22_spill]] %s2104_s30  ;;  %s36_s21 = ssub.s32 %s1919_s20, %s2104_s30 }
  0x52   : > { %p46_p7 = scmp.ne.s32.totalorder %s1915_s19, %s1911_s18  ;;  %p37_p5 = scmp.eq.s32.totalorder %s36_s21, 0 }
  0x53   : > { %p47_p8 = scmp.eq.s32.totalorder %s1919_s20, 0  ;;  %p52_p9 = scmp.ne.s32.totalorder %s1911_s18, %s1907_s17 }
  0x54   : > { %p291_p10 = scmp.eq.s32.totalorder %s2014_s23, 1  ;;  %p297_p0 = scmp.eq.s32.totalorder %s1265_s27, 1 }
  0x55   : > { %1548 = dma.hbm_to_vmem [thread:$0]  (!%p2028_p6), %s2378_s9, 1024, %s378_s25, [#allocation12], %s1924_s13, %s1924_s13, %s1925_s14  }
  0x56   : > { %s2116_s28 = scalar_select %p37_p5, %s1915_s19, %s39_s16  }
  0x57   : > { %p48_p11 = por %p47_p8, %p46_p7  ;;  %p2120_p12 = por %p2361_p1, %p52_p9 }
  0x58   : > { %2380 = sst [smem:[#allocation23_spill]] %s2116_s28  ;;  %p2124_p6 = por %p291_p10, %p46_p7 }
  0x59   : > { %s2381_s29 = scalar_select %p2120_p12, 1, 0 }
  0x5a   : > { %s2382_s13 = scalar_select %p2124_p6, 1, 0 }
  0x5b   : > { %p1565_p13 = scmp.lt.s32.totalorder %s1919_s20, 2  ;;  %s394_s14 = sand.u32 1, %s1915_s19  }
  0x5c   : > { %p2130_p2 = por %p297_p0, %p52_p9  ;;  %s2134_s22 = sshll.u32 %s394_s14, 2 }
  0x5d   : > { %s1274_s12 = sshll.u32 %s1919_s20, 6  ;;  %s398_s21 = scalar_lea.vmem [#allocation2], %s2134_s22 }
  0x5e   : > { %s2383_s25 = scalar_select %p2130_p2, 1, 0 }
  0x5f   : > { %s2140_s16 = scalar_lea.hbm %s2346_s0, %s1274_s12  ;;  %s405_s27 = sshll.u32 %s398_s21, 4  ;;  %s406_s27 = int_to_ptr.vmem [resolvable:$true] %s405_s27 }
  0x60   : > { %p2143_p7 = pnand %p1565_p13, %p48_p11  ;;  %s2150_s7 = scalar_lea.hbm %s2347_s1, %s1274_s12 }
  0x61   : > { %s395_s15 = scalar_lea.sflag [#allocation3], %s394_s14  ;;  %s1783_s26 = scalar_lea.hbm %s2140_s16, 64 }
  0x62   : > { %p1784_p5 = scmp.ne.s32.totalorder %s2140_s16, %s1783_s26  ;;  %p1785_p8 = pneg %p2143_p7 }
  0x63   : > { %s1788_s28 = scalar_lea.hbm %s2346_s0, 128  ;;  %p1789_p11 = scmp.lt.s32.totalorder %s2140_s16, %s2346_s0 }
  0x64   : > { %p1786_p9 = pnand %p1785_p8, %p1784_p5  ;;  %p1790_p0 = scmp.lt.s32.totalorder %s1788_s28, %s1783_s26 }
  0x66   : > { %p1787_p10 = pneg %p1786_p9  ;;  %p1791_p13 = por %p1790_p0, %p1789_p11 }
  0x68   : > { %p1792_p4 = pnand %p1791_p13, %p1787_p10 }
  0x6a   : > { %1795 = shalt.err (!%p1792_p4)
}
  0x6b   : > { %s1796_s4 = scalar_lea.vmem %s406_s27, 64  ;;  %s1928_s5 = smov [#allocation2]  }
  0x6c   : > { %p1797_p1 = scmp.ne.s32.totalorder %s406_s27, %s1796_s4  ;;  %s1801_s14 = sshll.u32 %s1928_s5, 4  ;;  %s1802_s14 = int_to_ptr.vmem [resolvable:$false] %s1801_s14 }
  0x6d   : > { %s1803_s9 = scalar_lea.vmem %s1802_s14, 128  ;;  %p1804_p9 = scmp.lt.s32.totalorder %s406_s27, %s1802_s14 }
  0x6e   : > { %p1799_p2 = pnand %p1797_p1, %p1785_p8  ;;  %p1805_p6 = scmp.lt.s32.totalorder %s1803_s9, %s1796_s4 }
  0x70   : > { %p1800_p5 = pneg %p1799_p2  ;;  %p1806_p12 = por %p1805_p6, %p1804_p9 }
  0x72   : > { %p1807_p3 = pnand %p1806_p12, %p1800_p5 }
  0x74   : > { %1810 = shalt.err (!%p1807_p3)
}
  0x75   : > { %1552 = dma.hbm_to_vmem [thread:$0]  (!%p2143_p7), %s2140_s16, 64, %s406_s27, %s395_s15  }
  0x76   : > { %s412_s19 = sand.u32 1, %s1919_s20   ;;  %s416_s30 = scalar_lea.vmem [#allocation5], %s2134_s22 }
  0x77   : > { %s423_s28 = sshll.u32 %s416_s30, 4  ;;  %s413_s12 = scalar_lea.sflag [#allocation6], %s412_s19  ;;  %s424_s28 = int_to_ptr.vmem [resolvable:$true] %s423_s28 }
  0x78   : > { %s1811_s26 = scalar_lea.hbm %s2150_s7, 64  ;;  %s1816_s5 = scalar_lea.hbm %s2347_s1, 128 }
  0x79   : > { %p1812_p1 = scmp.ne.s32.totalorder %s2150_s7, %s1811_s26  ;;  %p1817_p12 = scmp.lt.s32.totalorder %s2150_s7, %s2347_s1 }
  0x7a   : > { %p1818_p6 = scmp.lt.s32.totalorder %s1816_s5, %s1811_s26 }
  0x7b   : > { %p1814_p3 = pnand %p1812_p1, %p1785_p8 }
  0x7c   : > { %p1819_p2 = por %p1818_p6, %p1817_p12 }
  0x7d   : > { %p1815_p4 = pneg %p1814_p3 }
  0x7f   : > { %p1820_p10 = pnand %p1819_p2, %p1815_p4 }
  0x81   : > { %1823 = shalt.err (!%p1820_p10)
}
  0x82   : > { %s1824_s22 = scalar_lea.vmem %s424_s28, 64  ;;  %s1929_s16 = smov [#allocation5]  }
  0x83   : > { %p1825_p11 = scmp.ne.s32.totalorder %s424_s28, %s1824_s22  ;;  %s1829_s27 = sshll.u32 %s1929_s16, 4  ;;  %s1830_s27 = int_to_ptr.vmem [resolvable:$false] %s1829_s27 }
  0x84   : > { %s1831_s15 = scalar_lea.vmem %s1830_s27, 128  ;;  %p1832_p5 = scmp.lt.s32.totalorder %s424_s28, %s1830_s27 }
  0x85   : > { %p1827_p0 = pnand %p1825_p11, %p1785_p8  ;;  %p1833_p9 = scmp.lt.s32.totalorder %s1831_s15, %s1824_s22 }
  0x87   : > { %p1828_p13 = pneg %p1827_p0  ;;  %p1834_p1 = por %p1833_p9, %p1832_p5 }
  0x89   : > { %p1835_p3 = pnand %p1834_p1, %p1828_p13 }
  0x8b   : > { %1838 = shalt.err (!%p1835_p3)
}
  0x8c   : > { %1555 = dma.hbm_to_vmem [thread:$0]  (!%p2143_p7), %s2150_s7, 64, %s424_s28, %s413_s12  }
  0x8d   : > { %p2385_p4 = scmp.ne.s32.totalorder %s2371_s24, 0 }
  0x8e   : > { %s2195_s19 = sand.u32 (!%p2385_p4), 1, %s1911_s18   ;;  %p2386_p8 = scmp.ne.s32.totalorder (!%p2385_p4), %s2381_s29, 0 }
  0x8f   : > { %432 = sbr.rel (%p2385_p4) target bundleno = 1002 (0x3ea), region = 64  ;;  %s1278_s30 = sshll.u32 (!%p2385_p4), %s2195_s19, 2 }
  0x90   : > { %s435_s26 = scalar_lea.sflag (!%p2385_p4), [#allocation3], %s2195_s19  ;;  %s2199_s21 = scalar_lea.vmem (!%p2385_p4), [#allocation2], %s1278_s30 }
  0x94   : > { %1882 = dma.done.wait (%p2386_p8), %s435_s26, 64  }
  0x95   : > { %1884 = vsyncadd (%p2386_p8), %s435_s26, 4294967232  ;;  %s443_s2 = sand.u32 1, %s2014_s23   ;;  %s2206_s24 = scalar_lea.vmem [#allocation5], %s1278_s30 }
  0x96   : > { %s444_s7 = scalar_lea.sflag [#allocation6], %s443_s2 }
  0x97   : > { %1886 = dma.done.wait (%p2386_p8), %s444_s7, 64  }
  0x98   : > { %1888 = vsyncadd (%p2386_p8), %s444_s7, 4294967232  ;;  %p2387_p7 = scmp.eq.s32.totalorder %s2014_s23, 0 }
  0x9a   : > { %1890 = dma.done.wait (%p2387_p7), [#allocation6], 1024   ;;  %p2388_p12 = pmov %p2387_p7 }
  0x9b   : > { %p2389_p6 = pmov %p2387_p7 }
  0x9c   : > { %1892 = vsyncadd (%p2388_p12), [#allocation6], 4294966272 }
  0x9d   : > { %1894 = dma.done.wait (%p2389_p6), [#allocation9], 2048   ;;  %p2390_p2 = pmov %p2389_p6 }
  0x9f   : > { %1896 = vsyncadd (%p2390_p2), [#allocation9], 4294965248  ;;  %p2391_p10 = pmov %p2390_p2 }
  0xa0   : > { %p2392_p11 = pmov %p2390_p2 }
  0xa1   : > { %1898 = dma.done.wait (%p2391_p10), [#allocation12], 2048  }
  0xa2   : > { %1900 = vsyncadd (%p2392_p11), [#allocation12], 4294965248  ;;  %v1930_v0 = vmov 0.0   ;;  %vm1931_vm0 = vmmov 0   ;;  %v1613_v1 = vld [vmem:[#allocation7 + $0x38] sm:$0xff]   ;;  %v1614_v2 = vld [vmem:[#allocation7 + $0x30] sm:$0xff]   ;;  %v532_v27 = vlaneseq }
  0xa3   : > { %1387 = vmatprep.subr.bf16.mxu0 %v1930_v0  ;;  %1407 = vmatprep.subr.bf16.mxu1 %v1930_v0  ;;  %v1615_v3 = vld [vmem:[#allocation7 + $0x28] sm:$0xff]   ;;  %v1616_v4 = vld [vmem:[#allocation7 + $0x20] sm:$0xff]   ;;  %v1617_v5 = vld [vmem:[#allocation7 + $0x18] sm:$0xff]   ;;  %s1285_s9 = sshll.u32 %s2195_s19, 3  ;;  %s1330_s27 = sshll.u32 %s2014_s23, 7 }
  0xa4   : > { %1403 = vmatprep.mubr.msk.bf16.mxu0 %vm1931_vm0, %v1930_v0  ;;  %1423 = vmatprep.mubr.msk.bf16.mxu1 %vm1931_vm0, %v1930_v0  ;;  %v1618_v6 = vld [vmem:[#allocation7 + $0x10] sm:$0xff]   ;;  %v1619_v7 = vld [vmem:[#allocation7 + $0x8] sm:$0xff]   ;;  %v1620_v8 = vld [vmem:[#allocation7] sm:$0xff]   ;;  %v533_v28 = vshrl.u32 %v532_v27, 7  ;;  %s510_s15 = scalar_lea.vmem [#allocation14], %s1285_s9  ;;  %s2303_s2 = scalar_lea.hbm %s2357_s11, %s1330_s27 }
  0xa5   : > { %1388 = vmatpush3.bf16.msra.mxu0 %v1613_v1  ;;  %1408 = vmatpush3.bf16.msra.mxu1 %v1613_v1  ;;  %v530_v9 = vld [vmem:[%s2199_s21] sm:$0xf]  ;;  %v625_v10 = vld [vmem:[%s2206_s24] sm:$0xf]  ;;  %v1625_v15 = vld [vmem:[#allocation10 + $0x28] sm:$0xff]   ;;  %s1125_s30 = sshll.u32 %s510_s15, 4  ;;  %s2305_s30 = int_to_ptr.vmem [resolvable:$true] %s1125_s30 }
  0xa6   : > { %1389 = vmatprep.subr.bf16.mxu0 %v1930_v0  ;;  %1409 = vmatprep.subr.bf16.mxu1 %v1930_v0  ;;  %v1621_v11 = vld [vmem:[#allocation10 + $0x38] sm:$0xff]   ;;  %v1623_v13 = vld [vmem:[#allocation10 + $0x30] sm:$0xff]   ;;  %v1626_v16 = vld [vmem:[#allocation8 + $0x28] sm:$0xff]   ;;  %v534_v31 = vsub.s32 0, %v533_v28  ;;  %s1112_s7 = scalar_lea.sflag [#allocation4], %s2195_s19  ;;  %s1839_s24 = scalar_lea.vmem %s2305_s30, 128 }
  0xa7   : > { %v1622_v12 = vld [vmem:[#allocation8 + $0x38] sm:$0xff]   ;;  %v1624_v14 = vld [vmem:[#allocation8 + $0x30] sm:$0xff]   ;;  %v1627_v17 = vld [vmem:[#allocation10 + $0x20] sm:$0xff]   ;;  %p1840_p0 = scmp.ne.s32.totalorder %s2305_s30, %s1839_s24  ;;  %p2393_p13 = scmp.ne.s32.totalorder %s2382_s13, 0 }
  0xa8   : > { %v1628_v18 = vld [vmem:[#allocation8 + $0x20] sm:$0xff]   ;;  %v1629_v19 = vld [vmem:[#allocation10 + $0x18] sm:$0xff]   ;;  %v1631_v21 = vld [vmem:[#allocation10 + $0x10] sm:$0xff]   ;;  %s1932_s23 = smov [#allocation14]  }
  0xa9   : > { %1390 = vmatpush3.bf16.msra.mxu0 %v1614_v2  ;;  %1410 = vmatpush3.bf16.msra.mxu1 %v1614_v2  ;;  %v1630_v20 = vld [vmem:[#allocation8 + $0x18] sm:$0xff]   ;;  %v1632_v22 = vld [vmem:[#allocation8 + $0x10] sm:$0xff]   ;;  %v1633_v23 = vld [vmem:[#allocation10 + $0x8] sm:$0xff]   ;;  %p1841_p5 = pnand %p1840_p0, %p2393_p13  ;;  %s1843_s29 = sshll.u32 %s1932_s23, 4  ;;  %s1844_s29 = int_to_ptr.vmem [resolvable:$false] %s1843_s29 }
  0xaa   : > { %1391 = vmatprep.subr.bf16.mxu0 %v1930_v0  ;;  %1411 = vmatprep.subr.bf16.mxu1 %v1930_v0  ;;  %v1634_v24 = vld [vmem:[#allocation8 + $0x8] sm:$0xff]   ;;  %v1635_v25 = vld [vmem:[#allocation10] sm:$0xff]   ;;  %v528_v29 = vld [vmem:[%s2349_s3] sm:$0x1]  ;;  %s1845_s28 = scalar_lea.vmem %s1844_s29, 256  ;;  %p1846_p1 = scmp.lt.s32.totalorder %s2305_s30, %s1844_s29 }
  0xab   : > { %v1636_v26 = vld [vmem:[#allocation8] sm:$0xff]   ;;  %v529_v30 = vmul.f32 8.0, %v528_v29  ;;  %v1637_v39 = vld [vmem:[#allocation11 + $0x38] sm:$0xff]   ;;  %v1638_v46 = vld [vmem:[#allocation11 + $0x30] sm:$0xff]   ;;  %p1842_p9 = pneg %p1841_p5  ;;  %p1847_p3 = scmp.lt.s32.totalorder %s1845_s28, %s1839_s24 }
  0xac   : > { %v1639_v47 = vld [vmem:[#allocation11 + $0x28] sm:$0xff]   ;;  %v1640_v48 = vld [vmem:[#allocation11 + $0x20] sm:$0xff]   ;;  %v1641_v49 = vld [vmem:[#allocation11 + $0x18] sm:$0xff]  }
  0xad   : > { %1392 = vmatpush3.bf16.msra.mxu0 %v1615_v3  ;;  %1412 = vmatpush3.bf16.msra.mxu1 %v1615_v3  ;;  %v535_v32 = vrot.slane %v529_v30, %v534_v31  ;;  %v1642_v50 = vld [vmem:[#allocation11 + $0x10] sm:$0xff]   ;;  %v1643_v51 = vld [vmem:[#allocation11 + $0x8] sm:$0xff]   ;;  %v1644_v52 = vld [vmem:[#allocation11] sm:$0xff]   ;;  %p1848_p4 = por %p1847_p3, %p1846_p1 }
  0xae   : > { %1393 = vmatprep.subr.bf16.mxu0 %v1930_v0  ;;  %1413 = vmatprep.subr.bf16.mxu1 %v1930_v0  ;;  %v1645_v53 = vld [vmem:[#allocation13 + $0x38] sm:$0xff]   ;;  %v1646_v54 = vld [vmem:[#allocation13 + $0x30] sm:$0xff]   ;;  %v1647_v55 = vld [vmem:[#allocation13 + $0x28] sm:$0xff]  }
  0xaf   : > { %v1648_v56 = vld [vmem:[#allocation13 + $0x20] sm:$0xff]   ;;  %v1649_v57 = vld [vmem:[#allocation13 + $0x18] sm:$0xff]   ;;  %v1650_v58 = vld [vmem:[#allocation13 + $0x10] sm:$0xff]   ;;  %p1849_p8 = pnand %p1848_p4, %p1842_p9 }
  0xb0   : > { %v1310_v61 = vld [vmem:[%s2352_s6] ss:$0 sm:$0xff] }
  0xb1   : > { %1394 = vmatpush3.bf16.msra.mxu0 %v1616_v4  ;;  %1414 = vmatpush3.bf16.msra.mxu1 %v1616_v4 }
  0xb2   : > { %1395 = vmatprep.subr.bf16.mxu0 %v1930_v0  ;;  %1415 = vmatprep.subr.bf16.mxu1 %v1930_v0 }
  0xb5   : > { %1396 = vmatpush3.bf16.msra.mxu0 %v1617_v5  ;;  %1416 = vmatpush3.bf16.msra.mxu1 %v1617_v5 }
  0xb6   : > { %1397 = vmatprep.subr.bf16.mxu0 %v1930_v0  ;;  %1417 = vmatprep.subr.bf16.mxu1 %v1930_v0 }
  0xb9   : > { %1398 = vmatpush3.bf16.msra.mxu0 %v1618_v6  ;;  %1418 = vmatpush3.bf16.msra.mxu1 %v1618_v6 }
  0xba   : > { %1399 = vmatprep.subr.bf16.mxu0 %v1930_v0  ;;  %1419 = vmatprep.subr.bf16.mxu1 %v1930_v0 }
  0xbd   : > { %1400 = vmatpush3.bf16.msra.mxu0 %v1619_v7  ;;  %1420 = vmatpush3.bf16.msra.mxu1 %v1619_v7 }
  0xbe   : > { %1401 = vmatprep.subr.bf16.mxu0 %v1930_v0  ;;  %1421 = vmatprep.subr.bf16.mxu1 %v1930_v0 }
  0xc1   : > { %1402 = vmatpush3.bf16.msra.mxu0 %v1620_v8  ;;  %1422 = vmatpush3.bf16.msra.mxu1 %v1620_v8 }
  0xc2   : > { %1427 = vmatprep.subr.bf16.mxu0 %v1930_v0  ;;  %1447 = vmatprep.subr.bf16.mxu1 %v1930_v0 }
  0xc4   : > { %1404 = vmatmul.mubr.bf16.vlgmr.msra.gmra.mxu0 %v530_v9  ;;  %1424 = vmatmul.mubr.bf16.vlgmr.msra.gmra.mxu1 %v625_v10  ;;  %v1651_v9 = vld [vmem:[#allocation13 + $0x8] sm:$0xff]   ;;  %v1652_v10 = vld [vmem:[#allocation13] sm:$0xff]  }
  0xc5   : > { %1428 = vmatpush3.bf16.msra.mxu0 %v1621_v11  ;;  %1448 = vmatpush3.bf16.msra.mxu1 %v1622_v12  ;;  %v1311_v11 = vld [vmem:[%s2354_s8] ss:$0 sm:$0xff] }
  0xc6   : > { %1429 = vmatprep.subr.bf16.mxu0 %v1930_v0  ;;  %1449 = vmatprep.subr.bf16.mxu1 %v1930_v0 }
  0xc7   : > { %1443 = vmatprep.mubr.msk.bf16.mxu0 %vm1931_vm0, %v1930_v0  ;;  %1463 = vmatprep.mubr.msk.bf16.mxu1 %vm1931_vm0, %v1930_v0 }
  0xc9   : > { %1430 = vmatpush3.bf16.msra.mxu0 %v1623_v13  ;;  %1450 = vmatpush3.bf16.msra.mxu1 %v1624_v14 }
  0xca   : > { %1431 = vmatprep.subr.bf16.mxu0 %v1930_v0  ;;  %1451 = vmatprep.subr.bf16.mxu1 %v1930_v0 }
  0xcd   : > { %1432 = vmatpush3.bf16.msra.mxu0 %v1625_v15  ;;  %1452 = vmatpush3.bf16.msra.mxu1 %v1626_v16 }
  0xce   : > { %1433 = vmatprep.subr.bf16.mxu0 %v1930_v0  ;;  %1453 = vmatprep.subr.bf16.mxu1 %v1930_v0 }
  0xd1   : > { %1434 = vmatpush3.bf16.msra.mxu0 %v1627_v17  ;;  %1454 = vmatpush3.bf16.msra.mxu1 %v1628_v18 }
  0xd2   : > { %1435 = vmatprep.subr.bf16.mxu0 %v1930_v0  ;;  %1455 = vmatprep.subr.bf16.mxu1 %v1930_v0 }
  0xd5   : > { %1436 = vmatpush3.bf16.msra.mxu0 %v1629_v19  ;;  %1456 = vmatpush3.bf16.msra.mxu1 %v1630_v20 }
  0xd6   : > { %1437 = vmatprep.subr.bf16.mxu0 %v1930_v0  ;;  %1457 = vmatprep.subr.bf16.mxu1 %v1930_v0 }
  0xd9   : > { %1438 = vmatpush3.bf16.msra.mxu0 %v1631_v21  ;;  %1458 = vmatpush3.bf16.msra.mxu1 %v1632_v22 }
  0xda   : > { %1439 = vmatprep.subr.bf16.mxu0 %v1930_v0  ;;  %1459 = vmatprep.subr.bf16.mxu1 %v1930_v0 }
  0xdd   : > { %1440 = vmatpush3.bf16.msra.mxu0 %v1633_v23  ;;  %1460 = vmatpush3.bf16.msra.mxu1 %v1634_v24 }
  0xde   : > { %1441 = vmatprep.subr.bf16.mxu0 %v1930_v0  ;;  %1461 = vmatprep.subr.bf16.mxu1 %v1930_v0 }
  0xe1   : > { %1442 = vmatpush3.bf16.msra.mxu0 %v1635_v25  ;;  %1462 = vmatpush3.bf16.msra.mxu1 %v1636_v26 }
  0xe2   : > { %1467 = vmatprep.subr.bf16.mxu0 %v1930_v0  ;;  %1487 = vmatprep.subr.bf16.mxu1 %v1930_v0 }
 0x184   : > { %v619_v33 = vpop.f32.mrf.mxu0  ;;  %v660_v34 = vpop.f32.mrf.mxu1 }
 0x185   : > { %v620_v35 = vadd.f32 %v619_v33, %v535_v32  ;;  %v661_v36 = vadd.f32 %v660_v34, %v535_v32 }
 0x186   : > { %v1405_v37 = vpop.f32.mrf.mxu0  ;;  %v1425_v38 = vpop.f32.mrf.mxu1 }
 0x187   : > { %v666_v40 = vpack.c.bf16 %v620_v35, %v620_v35  ;;  %v683_v41 = vpack.c.bf16 %v661_v36, %v661_v36 }
 0x188   : > { %v622_v42 = vpop.f32.mrf.mxu0  ;;  %v663_v43 = vpop.f32.mrf.mxu1 }
 0x189   : > { %1444 = vmatmul.mubr.bf16.vlgmr.msra.gmra.mxu0 %v683_v41  ;;  %1464 = vmatmul.mubr.bf16.vlgmr.msra.gmra.mxu1 %v666_v40 }
 0x18a   : > { %v1406_v44 = vpop.f32.mrf.mxu0  ;;  %v1426_v45 = vpop.f32.mrf.mxu1  ;;  %1468 = vmatpush3.bf16.msra.mxu0 %v1637_v39  ;;  %1483 = vmatprep.mubr.msk.bf16.mxu0 %vm1931_vm0, %v1930_v0 }
 0x18b   : > { %1469 = vmatprep.subr.bf16.mxu0 %v1930_v0  ;;  %1503 = vmatprep.mubr.msk.bf16.mxu1 %vm1931_vm0, %v1930_v0 }
 0x18c   : > { %1488 = vmatpush3.bf16.msra.mxu1 %v1645_v53 }
 0x18d   : > { %1489 = vmatprep.subr.bf16.mxu1 %v1930_v0 }
 0x18e   : > { %1470 = vmatpush3.bf16.msra.mxu0 %v1638_v46 }
 0x18f   : > { %1471 = vmatprep.subr.bf16.mxu0 %v1930_v0 }
 0x190   : > { %1490 = vmatpush3.bf16.msra.mxu1 %v1646_v54 }
 0x191   : > { %1491 = vmatprep.subr.bf16.mxu1 %v1930_v0 }
 0x192   : > { %1472 = vmatpush3.bf16.msra.mxu0 %v1639_v47 }
 0x193   : > { %1473 = vmatprep.subr.bf16.mxu0 %v1930_v0 }
 0x194   : > { %1492 = vmatpush3.bf16.msra.mxu1 %v1647_v55 }
 0x195   : > { %1493 = vmatprep.subr.bf16.mxu1 %v1930_v0 }
 0x196   : > { %1474 = vmatpush3.bf16.msra.mxu0 %v1640_v48 }
 0x197   : > { %1475 = vmatprep.subr.bf16.mxu0 %v1930_v0 }
 0x198   : > { %1494 = vmatpush3.bf16.msra.mxu1 %v1648_v56 }
 0x199   : > { %1495 = vmatprep.subr.bf16.mxu1 %v1930_v0 }
 0x19a   : > { %1476 = vmatpush3.bf16.msra.mxu0 %v1641_v49 }
 0x19b   : > { %1477 = vmatprep.subr.bf16.mxu0 %v1930_v0 }
 0x19c   : > { %1496 = vmatpush3.bf16.msra.mxu1 %v1649_v57 }
 0x19d   : > { %1497 = vmatprep.subr.bf16.mxu1 %v1930_v0 }
 0x19e   : > { %1478 = vmatpush3.bf16.msra.mxu0 %v1642_v50 }
 0x19f   : > { %1479 = vmatprep.subr.bf16.mxu0 %v1930_v0 }
 0x1a0   : > { %1498 = vmatpush3.bf16.msra.mxu1 %v1650_v58 }
 0x1a1   : > { %1499 = vmatprep.subr.bf16.mxu1 %v1930_v0 }
 0x1a2   : > { %1480 = vmatpush3.bf16.msra.mxu0 %v1643_v51 }
 0x1a3   : > { %1481 = vmatprep.subr.bf16.mxu0 %v1930_v0 }
 0x1a4   : > { %1500 = vmatpush3.bf16.msra.mxu1 %v1651_v9 }
 0x1a5   : > { %1501 = vmatprep.subr.bf16.mxu1 %v1930_v0  ;;  %v1320_v0 = vld [vmem:[%s2356_s10] ss:$0 sm:$0xff] }
 0x1a6   : > { %1482 = vmatpush3.bf16.msra.mxu0 %v1644_v52 }
 0x1a8   : > { %1502 = vmatpush3.bf16.msra.mxu1 %v1652_v10 }
 0x249   : > { %v782_v59 = vpop.f32.mrf.mxu0  ;;  %v870_v60 = vpop.f32.mrf.mxu1 }
 0x24a   : > { %v871_v62 = vadd.f32 %v870_v60, %v782_v59 }
 0x24b   : > { %v1445_v63 = vpop.f32.mrf.mxu0  ;;  %v1465_v1 = vpop.f32.mrf.mxu1 }
 0x24c   : > { %v883_v2 = vadd.f32 %v1310_v61, %v871_v62 }
 0x24d   : > { %v785_v3 = vpop.f32.mrf.mxu0  ;;  %v873_v4 = vpop.f32.mrf.mxu1 }
 0x24e   : > { %v884_v5 = vmax.f32 %v883_v2, 0.0 }
 0x24f   : > { %v1446_v6 = vpop.f32.mrf.mxu0  ;;  %v1466_v7 = vpop.f32.mrf.mxu1 }
 0x250   : > { %v885_v8 = vpack.c.bf16 %v884_v5, %v884_v5 }
 0x252   : > { %1484 = vmatmul.mubr.bf16.vlgmr.msra.gmra.mxu0 %v885_v8 }
 0x312   : > { %v991_v12 = vpop.f32.mrf.mxu0 }
 0x313   : > { %v992_v13 = vadd.f32 %v1311_v11, %v991_v12 }
 0x314   : > { %v1485_v14 = vpop.f32.mrf.mxu0 }
 0x315   : > { %v997_v15 = vmax.f32 %v992_v13, 0.0 }
 0x316   : > { %v994_v16 = vpop.f32.mrf.mxu0 }
 0x317   : > { %v998_v17 = vpack.c.bf16 %v997_v15, %v997_v15 }
 0x318   : > { %v1486_v18 = vpop.f32.mrf.mxu0 }
 0x319   : > { %1504 = vmatmul.mubr.bf16.vlgmr.msra.gmra.mxu1 %v998_v17 }
 0x3d9   : > { %v1104_v19 = vpop.f32.mrf.mxu1 }
 0x3da   : > { %v1105_v20 = vadd.f32 %v1320_v0, %v1104_v19 }
 0x3db   : > { %v1505_v21 = vpop.f32.mrf.mxu1 }
 0x3dc   : > { %1110 = vst [vmem:[%s510_s15] sm:$0xff] %v1105_v20 }
 0x3dd   : > { %v1107_v22 = vpop.f32.mrf.mxu1 }
 0x3de   : > { %1852 = shalt.err (!%p1849_p8)
}
 0x3df   : > { %s1853_s12 = scalar_lea.hbm %s2303_s2, 128  ;;  %s1857_s5 = scalar_lea.hbm %s2357_s11, 256 }
 0x3e0   : > { %p1854_p7 = scmp.ne.s32.totalorder %s2303_s2, %s1853_s12  ;;  %p1858_p2 = scmp.lt.s32.totalorder %s2303_s2, %s2357_s11 }
 0x3e1   : > { %p1859_p10 = scmp.lt.s32.totalorder %s1857_s5, %s1853_s12 }
 0x3e2   : > { %p1855_p12 = pnand %p1854_p7, %p2393_p13 }
 0x3e3   : > { %p1860_p11 = por %p1859_p10, %p1858_p2 }
 0x3e4   : > { %p1856_p6 = pneg %p1855_p12 }
 0x3e6   : > { %p1861_p0 = pnand %p1860_p11, %p1856_p6 }
 0x3e8   : > { %1864 = shalt.err (!%p1861_p0)
}
 0x3e9   : > { %1531 = dma.vmem_to_hbm [thread:$0]  (%p2393_p13), %s2305_s30, 128, %s2303_s2, %s1112_s7   ;;  %v1506_v23 = vpop.f32.mrf.mxu1 }
 0x3ea PF: > { %s1137_s22 = sand.u32 1, %s1907_s17   ;;  %p2394_p5 = scmp.ne.s32.totalorder %s2383_s25, 0 }
 0x3eb   : > { %p2395_p9 = scmp.ge.s32.totalorder %s1919_s20, 2  ;;  %s1138_s16 = scalar_lea.sflag [#allocation4], %s1137_s22 }
 0x3ed   : > { %p1557_p1 = pnand %p2395_p9, %p2394_p5 }
 0x3ef   : > { %p1558_p3 = pneg %p1557_p1 }
 0x3f1   : > { %1902 = dma.done.wait (%p1558_p3), %s1138_s16, 128  }
 0x3f2   : > { %1904 = vsyncadd (%p1558_p3), %s1138_s16, 4294967168  ;;  %s2396_s20 = sld [smem:[#allocation22_spill]]  ;;  %s2399_s17 = smov %s1911_s18 }
 0x3f3   : > { %s2397_s27 = sld [smem:[#allocation21_spill]] }
 0x3f4   : > { %s2398_s19 = sld [smem:[#allocation23_spill]] }
 0x3f8   : > { %p29_p4 = scmp.ge.s32.totalorder %s2396_s20, 4  }
 0x3f9   : > { %s2400_s18 = smov %s2397_s27 }
 0x3fa   :  { %31 = sbr.rel (!%p29_p4) target bundleno = 15 (0xf), region = 142 }
 0x3ff   :  { %1143 = vsyncpa [#allocation3], 1 }
 0x400   :  { %1145 = vsyncpa [#allocation3 + $0x1], 1 }
 0x401   :  { %1146 = vsyncpa [#allocation6], 1 }
 0x402   :  { %1148 = vsyncpa [#allocation6 + $0x1], 1 }
 0x403   :  { %1149 = vsyncpa [#allocation9], 1 }
 0x404   :  { %1150 = vsyncpa [#allocation12], 1 }
 0x405   :  { %1151 = vsyncpa [#allocation4], 1 }
 0x406   :  { %1153 = vsyncpa [#allocation4 + $0x1], 1 }

</bundles_post_ra>
